<compile_context>
chip_gen: v7x
topology: tpu7x:2x2x1
jax: 0.10.0
libtpu: 0.0.40
codegen_flags: <defaults>
</compile_context>

<pallas_src>
import functools

import jax
import jax.numpy as jnp
from jax.experimental import pallas as pl
from jax.experimental.pallas import tpu as pltpu


def _channel_pool_kernel(x_ref, o_ref, *, inv_c):
    # x_ref: (1, C, T) tile in VMEM; o_ref: (1, 1, T).
    x = x_ref[0]                                               # (C, T), loaded once
    s = jnp.sum(x.astype(jnp.float32), axis=0, keepdims=True)  # f32 accumulation (VALU tree)
    m = jnp.max(x, axis=0, keepdims=True)                      # max in input dtype (exact)
    o_ref[0] = (s * inv_c + m.astype(jnp.float32)).astype(o_ref.dtype)


def _pick_spatial_tile(C, HW, itemsize, *, tile_cap=8192,
                       vmem_budget_bytes=8 * 1024 * 1024):
    """Lane-dense tile T: multiple of 128, capped, and sized so the
    double-buffered (input + output) blocks fit a conservative VMEM budget
    that works on every generation (v5e 16 MiB default scoped, v7x 64 MiB
    physical)."""
    hw_pad128 = 128 * pl.cdiv(HW, 128)
    t_budget = vmem_budget_bytes // (2 * (C + 1) * itemsize)
    t_budget = max(128, (t_budget // 128) * 128)
    return min(tile_cap, t_budget, hw_pad128)


def channel_pool(x):
    """x: (B, C, H, W) -> (B, 1, H, W); avg-over-C + max-over-C."""
    B, C, H, W = x.shape
    HW = H * W
    itemsize = jnp.dtype(x.dtype).itemsize

    T = _pick_spatial_tile(C, HW, itemsize)
    n_t = pl.cdiv(HW, T)

    # Free reshape for contiguous NCHW; no padding copy — the last spatial
    # block may be ragged and Pallas masks its out-of-bounds columns.
    x2 = x.reshape(B, C, HW)

    kernel = functools.partial(_channel_pool_kernel, inv_c=1.0 / C)

    out = pl.pallas_call(
        kernel,
        out_shape=jax.ShapeDtypeStruct((B, 1, HW), x.dtype),
        grid_spec=pltpu.PrefetchScalarGridSpec(
            num_scalar_prefetch=0,
            grid=(B, n_t),
            in_specs=[pl.BlockSpec((1, C, T), lambda b, t: (b, 0, t))],
            out_specs=pl.BlockSpec((1, 1, T), lambda b, t: (b, 0, t)),
        ),
        compiler_params=pltpu.CompilerParams(
            # Both axes independent -> shardable across v7x's 2 TensorCores;
            # no-op on single-TC v5e/v6e.
            dimension_semantics=("parallel", "parallel"),
            # Raise v5e's 16 MiB default; 32 MiB is the default (and safe)
            # scoped limit on v6e/v7x as well.
            vmem_limit_bytes=32 * 1024 * 1024,
        ),
        cost_estimate=pl.CostEstimate(
            flops=2 * B * C * HW,
            transcendentals=0,
            bytes_accessed=(B * C * HW + B * HW) * itemsize,
        ),
    )(x2)

    return out.reshape(B, 1, H, W)


def channel_pool_ref(x):
    # Pure-JAX reference mirroring the PyTorch forward.
    return jnp.mean(x, axis=1, keepdims=True) + jnp.max(x, axis=1, keepdims=True)


if __name__ == "__main__":
    key = jax.random.PRNGKey(0)

    # Primary small case matching the module's typical use.
    x = jax.random.normal(key, (2, 4, 16, 16), dtype=jnp.float32)
    out = channel_pool(x)
    jax.block_until_ready(out)
    ref = channel_pool_ref(x)
    assert out.shape == (2, 1, 16, 16)
    assert jnp.allclose(out, ref, atol=1e-5, rtol=1e-5)

    # Ragged spatial size (HW = 49 not a multiple of 128) exercises the
    # partial-block path that replaced the explicit pad.
    k2 = jax.random.PRNGKey(1)
    x2 = jax.random.normal(k2, (2, 8, 7, 7), dtype=jnp.float32)
    out2 = channel_pool(x2)
    jax.block_until_ready(out2)
    ref2 = channel_pool_ref(x2)
    assert out2.shape == (2, 1, 7, 7)
    assert jnp.allclose(out2, ref2, atol=1e-5, rtol=1e-5)

    print("KERNEL_OK")
</pallas_src>

<mosaic_0001>
module attributes {stable_mosaic.version = 11 : i64} {
  func.func @_channel_pool_kernel(%arg0: i32, %arg1: i32, %arg2: memref<1x4x256xf32, #tpu.memory_space<vmem>>, %arg3: memref<1x1x256xf32, #tpu.memory_space<vmem>>) attributes {dimension_semantics = [#tpu.dimension_semantics<parallel>, #tpu.dimension_semantics<parallel>], iteration_bounds = array<i64: 2, 1>, scalar_prefetch = 0 : i64, scratch_operands = 0 : i64, tpu.core_type = #tpu.core_type<tc>, window_params = [{transform_indices = @transform_0, window_bounds = array<i64: 1, 4, 256>}, {transform_indices = @transform_1, window_bounds = array<i64: 1, 1, 256>}]} {
    %c0 = arith.constant 0 : index
    %c0_0 = arith.constant 0 : index
    %c0_1 = arith.constant 0 : index
    %0 = vector.load %arg2[%c0, %c0_0, %c0_1] : memref<1x4x256xf32, #tpu.memory_space<vmem>>, vector<1x4x256xf32>
    %1 = vector.shape_cast %0 : vector<1x4x256xf32> to vector<4x256xf32>
    %cst = arith.constant dense<0.000000e+00> : vector<256xf32>
    %2 = vector.multi_reduction <add>, %1, %cst [0] : vector<4x256xf32> to vector<256xf32>
    %3 = vector.shape_cast %2 : vector<256xf32> to vector<1x256xf32>
    %cst_2 = arith.constant dense<0xFF800000> : vector<256xf32>
    %4 = vector.multi_reduction <maximumf>, %1, %cst_2 [0] : vector<4x256xf32> to vector<256xf32>
    %5 = vector.shape_cast %4 : vector<256xf32> to vector<1x256xf32>
    %cst_3 = arith.constant 2.500000e-01 : f32
    %6 = vector.broadcast %cst_3 : f32 to vector<1x256xf32>
    %7 = arith.mulf %3, %6 : vector<1x256xf32>
    %8 = arith.addf %7, %5 : vector<1x256xf32>
    %c0_4 = arith.constant 0 : index
    %c0_5 = arith.constant 0 : index
    %c0_6 = arith.constant 0 : index
    %9 = vector.load %arg3[%c0_4, %c0_5, %c0_6] : memref<1x1x256xf32, #tpu.memory_space<vmem>>, vector<1x1x256xf32>
    %10 = vector.shape_cast %9 : vector<1x1x256xf32> to vector<1x256xf32>
    %11 = vector.shape_cast %8 : vector<1x256xf32> to vector<1x1x256xf32>
    tpu.vector_store %arg3[%c0_4, %c0_5, %c0_6], %11 {strides = array<i32>} : memref<1x1x256xf32, #tpu.memory_space<vmem>>, vector<1x1x256xf32>,
    return
  }
  func.func @transform_0(%arg0: i32, %arg1: i32) -> (i32, i32, i32) {
    %c0_i32 = arith.constant 0 : i32
    %c0_i32_0 = arith.constant 0 : i32
    return %arg0, %c0_i32, %arg1 : i32, i32, i32
  }
  func.func @transform_1(%arg0: i32, %arg1: i32) -> (i32, i32, i32) {
    %c0_i32 = arith.constant 0 : i32
    %c0_i32_0 = arith.constant 0 : i32
    return %arg0, %c0_i32, %arg1 : i32, i32, i32
  }
}

</mosaic_0001>

<bundles_post_ra>
// kernel: tpu_custom_call.1
= control target key start
LH: loop header
LB: loop body
LE: loop exit
PB: predicated region body
PF: predicated region fallthrough
CT: control target
= control target key end

     0   :  { %6 = vsyncpa [#allocation3], 0  ;;  %s695_s0 = inlined_call_operand.hbm [shape: f32[2,4,256], index: 0, kind: input, shape index: {}]   ;;  %s696_s1 = inlined_call_operand.hbm [shape: f32[2,1,256], index: 1, kind: output, shape index: {}]  }
   0x1   :  { %8 = vsyncpa [#allocation3 + $0x1], 0 }
   0x2   :  { %9 = vsyncpa [#allocation4], 0 }
   0x3   :  { %11 = vsyncpa [#allocation4 + $0x1], 0  ;;  %s522_s6 = smov 0   ;;  %s524_s7 = smov 0  }
   0x4   :  { %s526_s8 = smov 0   ;;  %s528_s9 = smov 0  }
   0x5   :  { %s530_s10 = smov 0   ;;  %s532_s11 = smov 0  }
   0x6 LB: > { %s314_s12 = sadd.s32 4294967295, %s507_s11   ;;  %s315_s13 = sadd.s32 4294967294, %s507_s11   ;;  %s507_s11 = sphi %s532_s11, %s17_s11   ;;  %s503_s10 = sphi %s530_s10, %s712_s10   ;;  %s499_s9 = sphi %s528_s9, %s711_s9   ;;  %s495_s8 = sphi %s526_s8, %s710_s8   ;;  %s491_s7 = sphi %s524_s7, %s709_s7   ;;  %s487_s6 = sphi %s522_s6, %s708_s6  }
   0x7   : > { %s29_s14 = sadd.s32 1, %s503_s10  ;;  %s38_s15 = sadd.s32 1, %s495_s8 }
   0x8   : > { %p31_p0 = scmp.ge.s32.totalorder %s29_s14, 2  ;;  %p45_p1 = scmp.ne.s32.totalorder %s495_s8, %s491_s7 }
   0x9   : > { %p46_p2 = scmp.eq.s32.totalorder %s507_s11, 0  ;;  %p51_p3 = scmp.ne.s32.totalorder %s491_s7, %s487_s6 }
   0xa   : > { %s714_s14 = smov (%p31_p0, %s29_s14), 0  ;;  %p52_p5 = scmp.eq.s32.totalorder %s314_s12, 0 }
   0xb   : > { %p563_p4 = por %p46_p2, %p45_p1  ;;  %s33_s17 = ssub.s32 %s503_s10, %s714_s14 }
   0xc   : > { %p77_p6 = scmp.eq.s32.totalorder %s314_s12, 1  ;;  %p36_p7 = scmp.eq.s32.totalorder %s33_s17, 0 }
   0xd   : > { %p569_p8 = por %p52_p5, %p51_p3  ;;  %p83_p10 = scmp.eq.s32.totalorder %s315_s13, 1 }
   0xe   : > { %p573_p9 = por %p77_p6, %p45_p1  ;;  %p343_p13 = scmp.lt.s32.totalorder %s507_s11, 2 }
   0xf   : > { %s578_s20 = scalar_select %p36_p7, %s495_s8, %s38_s15  }
  0x10   : > { %s700_s19 = scalar_select %p573_p9, 1, 0 }
  0x11   : > { %p580_p11 = por %p83_p10, %p51_p3  ;;  %s103_s22 = sand.u32 1, %s495_s8  }
  0x12   : > { %s318_s23 = sshll.u32 %s103_s22, 3  ;;  %s329_s24 = sshll.u32 %s503_s10, 7 }
  0x13   : > { %s701_s21 = scalar_select %p580_p11, 1, 0 }
  0x14   : > { %s591_s27 = scalar_lea.hbm %s695_s0, %s329_s24  ;;  %s107_s28 = scalar_lea.vmem [#allocation2], %s318_s23 }
  0x15   : > { %s117_s29 = sshll.u32 %s107_s28, 4  ;;  %p597_p0 = pnand %p343_p13, %p563_p4  ;;  %s593_s29 = int_to_ptr.vmem [resolvable:$true] %s117_s29 }
  0x16   : > { %s104_s2 = scalar_lea.sflag [#allocation3], %s103_s22  ;;  %s395_s3 = scalar_lea.hbm %s591_s27, 128 }
  0x17   : > { %p396_p3 = scmp.ne.s32.totalorder %s591_s27, %s395_s3  ;;  %p397_p5 = pneg %p597_p0 }
  0x18   : > { %s400_s12 = scalar_lea.hbm %s695_s0, 256  ;;  %p401_p4 = scmp.lt.u32.totalorder %s591_s27, %s695_s0 }
  0x19   : > { %p398_p6 = pnand %p397_p5, %p396_p3  ;;  %p402_p10 = scmp.lt.u32.totalorder %s400_s12, %s395_s3 }
  0x1a   : > { %p404_p12 = scmp.lt.u32.totalorder %s395_s3, %s591_s27 }
  0x1b   : > { %p399_p7 = pneg %p398_p6  ;;  %p403_p13 = por %p402_p10, %p401_p4 }
  0x1d   : > { %p405_p1 = por %p404_p12, %p403_p13 }
  0x1f   : > { %p406_p2 = pnand %p405_p1, %p399_p7 }
  0x21   : > { %409 = shalt.err (!%p406_p2)
}
  0x22   : > { %s410_s16 = scalar_lea.vmem %s593_s29, 128  ;;  %s509_s17 = smov [#allocation2]  }
  0x23   : > { %p411_p3 = scmp.ne.s32.totalorder %s593_s29, %s410_s16  ;;  %s415_s22 = sshll.u32 %s509_s17, 4  ;;  %s416_s22 = int_to_ptr.vmem [resolvable:$false] %s415_s22 }
  0x24   : > { %s417_s23 = scalar_lea.vmem %s416_s22, 256  ;;  %p418_p9 = scmp.lt.s32.totalorder %s593_s29, %s416_s22 }
  0x25   : > { %p413_p6 = pnand %p411_p3, %p397_p5  ;;  %p419_p4 = scmp.lt.s32.totalorder %s417_s23, %s410_s16 }
  0x27   : > { %p414_p11 = pneg %p413_p6  ;;  %p420_p10 = por %p419_p4, %p418_p9 }
  0x29   : > { %p421_p12 = pnand %p420_p10, %p414_p11 }
  0x2b   : > { %424 = shalt.err (!%p421_p12)
}
  0x2c   : > { %338 = dma.hbm_to_vmem [thread:$0]  (!%p597_p0), %s591_s27, 128, %s593_s29, %s104_s2  }
  0x2d   : > { %p703_p1 = scmp.lt.s32.totalorder %s507_s11, 3  ;;  %p704_p2 = scmp.ge.s32.totalorder %s507_s11, 1 }
  0x2f   : > { %p123_p5 = pnand %p704_p2, %p703_p1 }
  0x30   : > { %s633_s24 = sand.u32 (!%p123_p5), 1, %s491_s7  }
  0x31   : > { %126 = sbr.rel (%p123_p5) target bundleno = 97 (0x61), region = 24  ;;  %s322_s25 = sshll.u32 (!%p123_p5), %s633_s24, 3 }
  0x32   : > { %s129_s26 = scalar_lea.sflag (!%p123_p5), [#allocation3], %s633_s24  ;;  %s132_s28 = scalar_lea.vmem (!%p123_p5), [#allocation2], %s322_s25 }
  0x38   : > { %478 = dma.done.wait (%p569_p8), %s129_s26, 128  }
  0x39   : > { %480 = vsyncadd (%p569_p8), %s129_s26, 4294967168  ;;  %vm157_vm0 = vcmask 1043456   ;;  %v153_v0 = vld [vmem:[%s132_s28] sm:$0xff]  ;;  %v510_v20 = vmov 1966171168   ;;  %v196_v22 = vlaneseq  ;;  %s323_s18 = sshll.u32 %s633_s24, 1 }
  0x3a   : > { %v155_v1 = vcombine.high %v153_v0, %v153_v0  ;;  %v158_v2 = vsel %vm157_vm0, %v153_v0, 0.0  ;;  %v172_v3 = vsel %vm157_vm0, %v153_v0, -inf  ;;  %v194_v21 = vunpack.c.l.s4 %v510_v20  ;;  %s150_s27 = scalar_lea.vmem [#allocation5], %s323_s18  ;;  %s330_s30 = sshll.u32 %s499_s9, 5 }
  0x3b   : > { %v159_v4 = vrot.slane %v158_v2, 4  ;;  %v173_v5 = vrot.slane %v172_v3, 4  ;;  %v197_v31 = vshrl.u32 %v196_v22, 7  ;;  %s230_s29 = sshll.u32 %s150_s27, 4  ;;  %vm210_vm1 = vcmp.lt.s32.totalorder %v196_v22, 256  ;;  %s648_s4 = scalar_lea.hbm %s696_s1, %s330_s30  ;;  %s643_s29 = int_to_ptr.vmem [resolvable:$true] %s230_s29 }
  0x3c   : > { %v165_v6 = vsel %vm157_vm0, %v155_v1, 0.0  ;;  %v179_v7 = vsel %vm157_vm0, %v155_v1, -inf  ;;  %v195_v35 = vunpack.c.0.s8 %v194_v21  ;;  %s214_s5 = scalar_lea.sflag [#allocation4], %s633_s24  ;;  %s425_s12 = scalar_lea.vmem %s643_s29, 32 }
  0x3d   : > { %v160_v8 = vadd.f32 %v159_v4, %v158_v2  ;;  %v166_v9 = vrot.slane %v165_v6, 4  ;;  %v174_v10 = vmax.f32 %v172_v3, %v173_v5  ;;  %v180_v11 = vrot.slane %v179_v7, 4  ;;  %p426_p8 = scmp.ne.s32.totalorder %s643_s29, %s425_s12  ;;  %p705_p9 = scmp.ne.s32.totalorder %s700_s19, 0 }
  0x3e   : > { %v198_v39 = vsub.s32 %v195_v35, %v197_v31  ;;  %s511_s9 = smov [#allocation5]  }
  0x3f   : > { %v161_v12 = vrot.slane %v160_v8, 2  ;;  %v167_v13 = vadd.f32 %v166_v9, %v165_v6  ;;  %v175_v14 = vrot.slane %v174_v10, 2  ;;  %v181_v15 = vmax.f32 %v179_v7, %v180_v11  ;;  %p427_p11 = pnand %p426_p8, %p705_p9  ;;  %s429_s13 = sshll.u32 %s511_s9, 4  ;;  %s430_s13 = int_to_ptr.vmem [resolvable:$false] %s429_s13 }
  0x40   : > { %s431_s15 = scalar_lea.vmem %s430_s13, 64  ;;  %p432_p7 = scmp.lt.s32.totalorder %s643_s29, %s430_s13 }
  0x41   : > { %v162_v16 = vadd.f32 %v161_v12, %v160_v8  ;;  %v168_v17 = vrot.slane %v167_v13, 2  ;;  %v176_v18 = vmax.f32 %v174_v10, %v175_v14  ;;  %v182_v19 = vrot.slane %v181_v15, 2  ;;  %p428_p0 = pneg %p427_p11  ;;  %p433_p13 = scmp.lt.s32.totalorder %s431_s15, %s425_s12 }
  0x43   : > { %v163_v23 = vrot.slane %v162_v16, 1  ;;  %v169_v24 = vadd.f32 %v168_v17, %v167_v13  ;;  %v177_v25 = vrot.slane %v176_v18, 1  ;;  %v183_v26 = vmax.f32 %v181_v15, %v182_v19  ;;  %p434_p3 = por %p433_p13, %p432_p7 }
  0x45   : > { %v164_v27 = vadd.f32 %v163_v23, %v162_v16  ;;  %v170_v28 = vrot.slane %v169_v24, 1  ;;  %v178_v29 = vmax.f32 %v176_v18, %v177_v25  ;;  %v184_v30 = vrot.slane %v183_v26, 1  ;;  %p435_p6 = pnand %p434_p3, %p428_p0 }
  0x47   : > { %v171_v32 = vadd.f32 %v170_v28, %v169_v24  ;;  %v185_v33 = vmax.f32 %v183_v26, %v184_v30  ;;  %v186_v34 = vmul.f32 0.25, %v164_v27 }
  0x49   : > { %v187_v36 = vmul.f32 0.25, %v171_v32  ;;  %v188_v37 = vadd.f32 %v186_v34, %v178_v29 }
  0x4b   : > { %v189_v38 = vadd.f32 %v187_v36, %v185_v33 }
  0x4d   : > { %v192_v40 = vcombine.low %v188_v37, %v189_v38 }
  0x4f   : > { %v199_v41 = vrot.slane %v192_v40, %v198_v39 }
  0x51   : > { %v206_v42 = vrot.slane %v199_v41, %v198_v39 }
  0x53   : > { %212 = vst.msk [vmem:[%s150_s27] sm:$0x3] %vm210_vm1, %v206_v42 }
  0x54   : > { %438 = shalt.err (!%p435_p6)
}
  0x55   : > { %s439_s16 = scalar_lea.hbm %s648_s4, 32  ;;  %s443_s23 = scalar_lea.hbm %s696_s1, 64 }
  0x56   : > { %p440_p4 = scmp.ne.s32.totalorder %s648_s4, %s439_s16  ;;  %p444_p1 = scmp.lt.u32.totalorder %s648_s4, %s696_s1 }
  0x57   : > { %p445_p2 = scmp.lt.u32.totalorder %s443_s23, %s439_s16  ;;  %p447_p8 = scmp.lt.u32.totalorder %s439_s16, %s648_s4 }
  0x58   : > { %p441_p10 = pnand %p440_p4, %p705_p9 }
  0x59   : > { %p446_p5 = por %p445_p2, %p444_p1 }
  0x5a   : > { %p442_p12 = pneg %p441_p10 }
  0x5b   : > { %p448_p11 = por %p447_p8, %p446_p5 }
  0x5d   : > { %p449_p0 = pnand %p448_p11, %p442_p12 }
  0x5f   : > { %452 = shalt.err (!%p449_p0)
}
  0x60   : > { %333 = dma.vmem_to_hbm [thread:$0]  (%p705_p9), %s643_s29, 32, %s648_s4, %s214_s5  }
  0x61 PF: > { %s242_s26 = sand.u32 1, %s487_s6   ;;  %p706_p7 = scmp.ne.s32.totalorder %s701_s21, 0 }
  0x62   : > { %p707_p13 = scmp.ge.s32.totalorder %s507_s11, 2  ;;  %s243_s28 = scalar_lea.sflag [#allocation4], %s242_s26 }
  0x64   : > { %p340_p3 = pnand %p707_p13, %p706_p7 }
  0x66   : > { %482 = dma.done.wait (!%p340_p3), %s243_s28, 32  }
  0x67   : > { %484 = vsyncadd (!%p340_p3), %s243_s28, 4294967264  ;;  %s17_s11 = sadd.s32 1, %s507_s11   ;;  %s708_s6 = smov %s491_s7 }
  0x68   : > { %p14_p6 = scmp.ge.s32.totalorder %s17_s11, 4   ;;  %s709_s7 = smov %s495_s8 }
  0x69   : > { %s710_s8 = smov %s578_s20  ;;  %s711_s9 = smov %s503_s10 }
  0x6a   : > { %s712_s10 = smov %s714_s14  ;;  %16 = sbr.rel (!%p14_p6) target bundleno = 6 (0x6), region = 69 }
  0x71   :  { %248 = vsyncpa [#allocation3], 1 }
  0x72   :  { %250 = vsyncpa [#allocation3 + $0x1], 1 }
  0x73   :  { %251 = vsyncpa [#allocation4], 1 }
  0x74   :  { %253 = vsyncpa [#allocation4 + $0x1], 1 }

</bundles_post_ra>
